<compile_context>
chip_gen: v6e
topology: v6e:2x2x1
jax: 0.10.0
libtpu: 0.0.40
codegen_flags: <defaults>
</compile_context>

<pallas_src>
import functools

import jax
import jax.numpy as jnp
from jax.experimental import pallas as pl
from jax.experimental.pallas import tpu as pltpu


def _hloss_kernel(x_ref, out_ref, acc_ref, *, n_rows, tm, steps):
    """Accumulate sum_rows(sum_j p_j * log p_j) for one (tm, C) row tile.

    x_ref:   (tm, C) logits tile in VMEM
    out_ref: (1, 1, 1) per-shard partial (resident across the reduction axis)
    acc_ref: (tm, 1) f32 per-row accumulator scratch
    """
    p = pl.program_id(0)          # shard (parallel axis — TensorCores on v7x)
    i = pl.program_id(1)          # row-tile step within the shard (reduction)

    @pl.when(i == 0)
    def _():
        acc_ref[...] = jnp.zeros_like(acc_ref)

    x = x_ref[...].astype(jnp.float32)

    # Row-validity mask: the last tile may run past n_rows (cdiv grid).
    step = p * steps + i
    row = step * tm + jax.lax.broadcasted_iota(jnp.int32, (tm, 1), 0)
    valid = row < n_rows
    x = jnp.where(valid, x, 0.0)   # keep padded rows finite

    # sum_j p_j log p_j = (sum_j e_j z_j) / S - log S   (single exp pass)
    m = jnp.max(x, axis=-1, keepdims=True)
    z = x - m
    e = jnp.exp(z)
    s = jnp.sum(e, axis=-1, keepdims=True)
    ez = jnp.sum(e * z, axis=-1, keepdims=True)
    contrib = ez * pl.reciprocal(s, approx=True) - jnp.log(s)   # (tm, 1)

    # Steady state: pure VALU add. Scalar collapse deferred to the epilogue.
    acc_ref[...] += jnp.where(valid, contrib, 0.0)

    @pl.when(i == steps - 1)
    def _():
        out_ref[...] = jnp.sum(acc_ref[...]).reshape(1, 1, 1)


def _pick_tm(n_rows, n_cols, sub):
    """Largest row tile such that the f32 working tile stays ~2 MiB."""
    budget_elems = (2 * 1024 * 1024) // 4           # 2 MiB of f32 per tile
    tm = min(2048, max(sub, budget_elems // max(n_cols, 1)))
    tm = max(sub, (tm // sub) * sub)
    n_padded = ((n_rows + sub - 1) // sub) * sub    # no point exceeding N
    return min(tm, n_padded)


def hloss(x, *, tm=None):
    """Negative entropy of softmax(x, axis=1), summed over all rows. () f32."""
    n_rows, n_cols = x.shape
    itemsize = jnp.dtype(x.dtype).itemsize
    sub = max(8, 32 // itemsize)                    # f32 -> 8, bf16 -> 16, int8 -> 32
    if tm is None:
        tm = _pick_tm(n_rows, n_cols, sub)
    tm = max(sub, ((tm + sub - 1) // sub) * sub)    # align to sublane tiling

    total_steps = -(-n_rows // tm)                  # cdiv
    # Split row tiles across TensorCores when possible (helps v7x, 2 TCs).
    n_shards = 2 if (total_steps >= 2 and total_steps % 2 == 0) else 1
    steps = total_steps // n_shards

    kernel = functools.partial(_hloss_kernel, n_rows=n_rows, tm=tm, steps=steps)

    partials = pl.pallas_call(
        kernel,
        out_shape=jax.ShapeDtypeStruct((n_shards, 1, 1), jnp.float32),
        grid_spec=pltpu.PrefetchScalarGridSpec(
            num_scalar_prefetch=0,
            grid=(n_shards, steps),
            in_specs=[pl.BlockSpec((tm, n_cols), lambda p, i: (p * steps + i, 0))],
            out_specs=pl.BlockSpec((1, 1, 1), lambda p, i: (p, 0, 0)),
            scratch_shapes=[pltpu.VMEM((tm, 1), jnp.float32)],
        ),
        compiler_params=pltpu.CompilerParams(
            dimension_semantics=("parallel", "arbitrary"),
            # Raise v5e's 16 MiB scoped default; safely <= physical VMEM on
            # v5e/v6e (128 MiB) and v7x (64 MiB).
            vmem_limit_bytes=32 * 1024 * 1024,
        ),
    )(x)
    return jnp.sum(partials)


def _hloss_ref(x):
    x = x.astype(jnp.float32)
    logp = jax.nn.log_softmax(x, axis=1)
    return jnp.sum(jax.nn.softmax(x, axis=1) * logp)


if __name__ == "__main__":
    key = jax.random.PRNGKey(0)
    k1, k2, k3 = jax.random.split(key, 3)

    # (batch, classes), matching the module's dim=1 softmax.
    x1 = jax.random.normal(k1, (8, 128), dtype=jnp.float32)          # basic
    x2 = jax.random.normal(k2, (13, 96), dtype=jnp.float32) * 2.0    # ragged rows (mask path)
    x3 = jax.random.normal(k3, (64, 128), dtype=jnp.float32)         # multi-tile + 2-shard path

    # Tolerance accounts for the EUP approximate reciprocal used for 1/S.
    for x, tile in ((x1, None), (x2, None), (x3, 16)):
        out = jax.block_until_ready(hloss(x, tm=tile))
        ref = _hloss_ref(x)
        assert jnp.allclose(out, ref, rtol=5e-3, atol=1e-3), (x.shape, out, ref)

    print("KERNEL_OK")
</pallas_src>

<mosaic_0001>
module attributes {stable_mosaic.version = 11 : i64} {
  func.func @_hloss_kernel(%arg0: i32, %arg1: i32, %arg2: memref<8x128xf32, #tpu.memory_space<vmem>>, %arg3: memref<1x1x1xf32, #tpu.memory_space<vmem>>, %arg4: memref<8x1xf32, #tpu.memory_space<vmem>>) attributes {dimension_semantics = [#tpu.dimension_semantics<parallel>, #tpu.dimension_semantics<arbitrary>], iteration_bounds = array<i64: 1, 1>, scalar_prefetch = 0 : i64, scratch_operands = 1 : i64, tpu.core_type = #tpu.core_type<tc>, window_params = [{transform_indices = @transform_0, window_bounds = array<i64: 8, 128>}, {transform_indices = @transform_1, window_bounds = array<i64: 1, 1, 1>}]} {
    %c0_i32 = arith.constant 0 : i32
    %0 = arith.cmpi eq, %arg1, %c0_i32 : i32
    %1 = arith.extui %0 : i1 to i32
    %c0_i32_0 = arith.constant 0 : i32
    %2 = arith.cmpi ne, %1, %c0_i32_0 : i32
    scf.if %2 {
      %cst_13 = arith.constant 0.000000e+00 : f32
      %38 = vector.broadcast %cst_13 : f32 to vector<8x1xf32>
      %c0_14 = arith.constant 0 : index
      %c0_15 = arith.constant 0 : index
      %39 = vector.load %arg4[%c0_14, %c0_15] : memref<8x1xf32, #tpu.memory_space<vmem>>, vector<8x1xf32>
      tpu.vector_store %arg4[%c0_14, %c0_15], %38 {strides = array<i32>} : memref<8x1xf32, #tpu.memory_space<vmem>>, vector<8x1xf32>,
    } else {
    }
    %c0 = arith.constant 0 : index
    %c0_1 = arith.constant 0 : index
    %3 = vector.load %arg2[%c0, %c0_1] : memref<8x128xf32, #tpu.memory_space<vmem>>, vector<8x128xf32>
    %c1_i32 = arith.constant 1 : i32
    %4 = arith.muli %arg0, %c1_i32 : i32
    %5 = arith.addi %4, %arg1 : i32
    %c8_i32 = arith.constant 8 : i32
    %6 = arith.muli %5, %c8_i32 : i32
    %7 = tpu.iota {dimensions = array<i32: 0>} : vector<8x1xi32>
    %8 = vector.broadcast %6 : i32 to vector<8x1xi32>
    %9 = arith.addi %8, %7 : vector<8x1xi32>
    %c8_i32_2 = arith.constant 8 : i32
    %10 = vector.broadcast %c8_i32_2 : i32 to vector<8x1xi32>
    %11 = arith.cmpi slt, %9, %10 : vector<8x1xi32>
    %cst = arith.constant 0.000000e+00 : f32
    %12 = vector.shape_cast %11 : vector<8x1xi1> to vector<8x1xi1>
    %13 = vector.broadcast %12 : vector<8x1xi1> to vector<8x128xi1>
    %14 = vector.broadcast %cst : f32 to vector<8x128xf32>
    %15 = arith.select %13, %3, %14 : vector<8x128xi1>, vector<8x128xf32>
    %cst_3 = arith.constant dense<0xFF800000> : vector<8xf32>
    %16 = vector.multi_reduction <maximumf>, %15, %cst_3 [1] : vector<8x128xf32> to vector<8xf32>
    %17 = vector.shape_cast %16 : vector<8xf32> to vector<8x1xf32>
    %18 = vector.broadcast %17 : vector<8x1xf32> to vector<8x128xf32>
    %19 = arith.subf %15, %18 : vector<8x128xf32>
    %20 = math.exp %19 : vector<8x128xf32>
    %cst_4 = arith.constant dense<0.000000e+00> : vector<8xf32>
    %21 = vector.multi_reduction <add>, %20, %cst_4 [1] : vector<8x128xf32> to vector<8xf32>
    %22 = vector.shape_cast %21 : vector<8xf32> to vector<8x1xf32>
    %23 = arith.mulf %20, %19 : vector<8x128xf32>
    %cst_5 = arith.constant dense<0.000000e+00> : vector<8xf32>
    %24 = vector.multi_reduction <add>, %23, %cst_5 [1] : vector<8x128xf32> to vector<8xf32>
    %25 = vector.shape_cast %24 : vector<8xf32> to vector<8x1xf32>
    %26 = tpu.reciprocal %22 {approx = true} : vector<8x1xf32> -> vector<8x1xf32>
    %27 = arith.mulf %25, %26 : vector<8x1xf32>
    %28 = math.log %22 : vector<8x1xf32>
    %29 = arith.subf %27, %28 : vector<8x1xf32>
    %c0_6 = arith.constant 0 : index
    %c0_7 = arith.constant 0 : index
    %30 = vector.load %arg4[%c0_6, %c0_7] : memref<8x1xf32, #tpu.memory_space<vmem>>, vector<8x1xf32>
    %cst_8 = arith.constant 0.000000e+00 : f32
    %31 = vector.broadcast %cst_8 : f32 to vector<8x1xf32>
    %32 = arith.select %11, %29, %31 : vector<8x1xi1>, vector<8x1xf32>
    %33 = arith.addf %30, %32 : vector<8x1xf32>
    %c0_9 = arith.constant 0 : index
    %c0_10 = arith.constant 0 : index
    %34 = vector.load %arg4[%c0_9, %c0_10] : memref<8x1xf32, #tpu.memory_space<vmem>>, vector<8x1xf32>
    tpu.vector_store %arg4[%c0_9, %c0_10], %33 {strides = array<i32>} : memref<8x1xf32, #tpu.memory_space<vmem>>, vector<8x1xf32>,
    %c0_i32_11 = arith.constant 0 : i32
    %35 = arith.cmpi eq, %arg1, %c0_i32_11 : i32
    %36 = arith.extui %35 : i1 to i32
    %c0_i32_12 = arith.constant 0 : i32
    %37 = arith.cmpi ne, %36, %c0_i32_12 : i32
    scf.if %37 {
      %c0_13 = arith.constant 0 : index
      %c0_14 = arith.constant 0 : index
      %38 = vector.load %arg4[%c0_13, %c0_14] : memref<8x1xf32, #tpu.memory_space<vmem>>, vector<8x1xf32>
      %39 = vector.shape_cast %38 : vector<8x1xf32> to vector<1x8x1xf32>
      %cst_15 = arith.constant dense<0.000000e+00> : vector<1xf32>
      %40 = vector.multi_reduction <add>, %39, %cst_15 [1, 2] : vector<1x8x1xf32> to vector<1xf32>
      %41 = vector.shape_cast %40 : vector<1xf32> to vector<1x1x1xf32>
      %42 = vector.extract %41[0, 0, 0] : f32 from vector<1x1x1xf32>
      %43 = vector.broadcast %42 : f32 to vector<1x1x1xf32>
      %c0_16 = arith.constant 0 : index
      %c0_17 = arith.constant 0 : index
      %c0_18 = arith.constant 0 : index
      %44 = vector.load %arg3[%c0_16, %c0_17, %c0_18] : memref<1x1x1xf32, #tpu.memory_space<vmem>>, vector<1x1x1xf32>
      tpu.vector_store %arg3[%c0_16, %c0_17, %c0_18], %43 {strides = array<i32>} : memref<1x1x1xf32, #tpu.memory_space<vmem>>, vector<1x1x1xf32>,
    } else {
    }
    return
  }
  func.func @transform_0(%arg0: i32, %arg1: i32) -> (i32, i32) {
    %c1_i32 = arith.constant 1 : i32
    %0 = arith.muli %arg0, %c1_i32 : i32
    %1 = arith.addi %0, %arg1 : i32
    %c0_i32 = arith.constant 0 : i32
    %c0_i32_0 = arith.constant 0 : i32
    return %1, %c0_i32 : i32, i32
  }
  func.func @transform_1(%arg0: i32, %arg1: i32) -> (i32, i32, i32) {
    %c0_i32 = arith.constant 0 : i32
    %c0_i32_0 = arith.constant 0 : i32
    %c0_i32_1 = arith.constant 0 : i32
    return %arg0, %c0_i32, %c0_i32_0 : i32, i32, i32
  }
}

</mosaic_0001>

<bundles_post_ra>
// kernel: tpu_custom_call.1
= control target key start
LH: loop header
LB: loop body
LE: loop exit
PB: predicated region body
PF: predicated region fallthrough
CT: control target
= control target key end

     0   :  { %6 = vsyncpa [#allocation4], 0  ;;  %s171_s0 = inlined_call_operand.hbm [shape: f32[8,128], index: 0, kind: input, shape index: {}]   ;;  %s172_s1 = inlined_call_operand.hbm [shape: f32[1,1,1], index: 1, kind: output, shape index: {}]  }
   0x1   :  { %7 = vsyncpa [#allocation5], 0  ;;  %s149_s6 = smov [#allocation3]  }
   0x2   :  { %s17_s7 = sshll.u32 %s149_s6, 4  ;;  %s18_s7 = int_to_ptr.vmem [resolvable:$true] %s17_s7 }
   0x3   :  { %s113_s8 = scalar_lea.vmem %s18_s7, 128  ;;  %p118_p1 = scmp.lt.s32.totalorder %s18_s7, %s18_s7 }
   0x4   :  { %p114_p0 = scmp.ne.s32.totalorder %s18_s7, %s113_s8  ;;  %p119_p2 = scmp.lt.s32.totalorder %s113_s8, %s113_s8 }
   0x6   :  { %p120_p3 = por %p119_p2, %p118_p1 }
   0x8   :  { %p121_p4 = pnand %p120_p3, %p114_p0 }
   0xa   :  { %124 = shalt.err (!%p121_p4)
}
   0xb   :  { %20 = dma.hbm_to_vmem [thread:$0]  %s171_s0, 128, %s18_s7, [#allocation4]  }
   0xc   :  { %145 = dma.done.wait [#allocation4], 128  }
   0xd   :  { %146 = vsyncadd [#allocation4], 4294967168  ;;  %v31_v0 = vld [vmem:[#allocation3] sm:$0xff]  ;;  %vm29_vm0 = vcmask 7168   ;;  %v150_v6 = vmov 0.0   ;;  %s151_s0 = smov [#allocation6]  }
   0xe   :  { %42 = vmax.xlane.f32.xlu0 %v31_v0  ;;  %30 = vst.msk [vmem:[#allocation2] sm:$0xff] %vm29_vm0, %v150_v6  ;;  %s85_s11 = sshll.u32 %s151_s0, 4  ;;  %vm77_vm1 = vcmask 0   ;;  %s86_s11 = int_to_ptr.vmem [resolvable:$true] %s85_s11 }
   0xf   :  { %s125_s13 = scalar_lea.vmem %s86_s11, 16  ;;  %s129_s14 = scalar_lea.vmem %s86_s11, 32 }
  0x10   :  { %p126_p5 = scmp.ne.s32.totalorder %s86_s11, %s125_s13  ;;  %p130_p6 = scmp.lt.s32.totalorder %s86_s11, %s86_s11 }
  0x11   :  { %p131_p7 = scmp.lt.s32.totalorder %s129_s14, %s125_s13 }
  0x13   :  { %p132_p8 = por %p131_p7, %p130_p6 }
  0x15   :  { %v57_v13 = vld [vmem:[#allocation2] sm:$0xff]  ;;  %p133_p9 = pnand %p132_p8, %p126_p5 }
  0x97   :  { %v43_v1 = vpop.xlane.xlu0 %42 }
  0x98   :  { %v44_v2 = vsub.f32 %v31_v0, %v43_v1 }
  0x9a   :  { %v45_v3 = vmul.f32 1.442695, %v44_v2 }
  0x9c   :  { %99 = vpow2.f32 %v45_v3 }
  0xa9   :  { %v100_v4 = vpop.eup %99 }
  0xaa   :  { %47 = vadd.xlane.f32.xlu0 %v100_v4  ;;  %v49_v5 = vmul.f32 %v100_v4, %v44_v2 }
  0xac   :  { %50 = vadd.xlane.f32.xlu1 %v49_v5 }
 0x133   :  { %v48_v7 = vpop.xlane.xlu0 %47 }
 0x134   :  { %101 = vrcp.f32 %v48_v7 }
 0x135   :  { %103 = vlog2.f32 %v48_v7  ;;  %v51_v9 = vpop.xlane.xlu1 %50 }
 0x141   :  { %v102_v8 = vpop.eup %101 }
 0x142   :  { %v104_v10 = vpop.eup %103  ;;  %v53_v11 = vmul.f32 %v102_v8, %v51_v9 }
 0x143   :  { %v55_v12 = vmul.f32 0.6931472, %v104_v10 }
 0x145   :  { %v56_v14 = vsub.f32 %v53_v11, %v55_v12 }
 0x147   :  { %v59_v15 = vadd.f32 %v57_v13, %v56_v14 }
 0x149   :  { %61 = vst.msk [vmem:[#allocation2] sm:$0xff] %vm29_vm0, %v59_v15 }
 0x150   :  { %v65_v16 = vld [vmem:[#allocation2] sm:$0xff] }
 0x151   :  { %v66_v17 = vsel %vm29_vm0, %v65_v16, 0.0 }
 0x152   :  { %67 = vadd.xlane.f32.xlu1 %v66_v17 }
 0x1db   :  { %v68_v18 = vpop.xlane.xlu1 %67 }
 0x1dc   :  { %v69_v19 = vrot.slane %v68_v18, 4 }
 0x1de   :  { %v70_v20 = vadd.f32 %v69_v19, %v68_v18 }
 0x1e0   :  { %v71_v21 = vrot.slane %v70_v20, 2 }
 0x1e2   :  { %v72_v22 = vadd.f32 %v71_v21, %v70_v20 }
 0x1e4   :  { %v73_v23 = vrot.slane %v72_v22, 1 }
 0x1e6   :  { %v74_v24 = vadd.f32 %v73_v23, %v72_v22 }
 0x1e8   :  { %94 = vpush %v74_v24 }
 0x219   :  { %s95_s12 = spop %94 }
 0x21a   :  { %v76_v25 = vstv %s95_s12 }
 0x21b   :  { %78 = vst.msk [vmem:[#allocation6] sm:$0x1] %vm77_vm1, %v76_v25 }
 0x21c   :  { %136 = shalt.err (!%p133_p9)
}
 0x21d   :  { %88 = dma.vmem_to_hbm [thread:$0]  %s86_s11, 16, %s172_s1, [#allocation5]  }
 0x21e   :  { %147 = dma.done.wait [#allocation5], 16  }
 0x21f   :  { %148 = vsyncadd [#allocation5], 4294967280 }
 0x220   :  { %92 = vsyncpa [#allocation4], 1 }
 0x221   :  { %93 = vsyncpa [#allocation5], 1 }

</bundles_post_ra>
